<compile_context>
chip_gen: v5e
topology: v5e:2x2
jax: 0.10.0
libtpu: 0.0.40
codegen_flags: <defaults>
</compile_context>

<pallas_src>
import jax
import jax.numpy as jnp
from jax.experimental import pallas as pl
from jax.experimental.pallas import tpu as pltpu


def _round_up(x, m):
    return (x + m - 1) // m * m


def _forward_dynamic_kernel(s_ref, a_ref, w1s_ref, w1a_ref, b1_ref,
                            w2_ref, b2_ref, o_ref):
    """Fused MLP tile: 2x matmul (split-W1) -> bias -> relu -> matmul -> bias."""
    # First layer: concat([state, action]) @ W1 == state @ W1_s + action @ W1_a.
    # Cast activations to bf16 on the VPU (hidden under the pipeline); weights
    # are already bf16; accumulate in f32 on the MXU.
    s_bf = s_ref[...].astype(jnp.bfloat16)
    a_bf = a_ref[...].astype(jnp.bfloat16)
    h = jnp.dot(s_bf, w1s_ref[...], preferred_element_type=jnp.float32)
    h = h + jnp.dot(a_bf, w1a_ref[...], preferred_element_type=jnp.float32)
    h = jnp.maximum(h + b1_ref[...], 0.0)                      # bias + ReLU (VPU, f32)
    # Second layer: bf16 operands, f32 accumulation.
    y = jnp.dot(h.astype(jnp.bfloat16), w2_ref[...],
                preferred_element_type=jnp.float32)
    o_ref[...] = (y + b2_ref[...]).astype(o_ref.dtype)


def forward_dynamic(state, action, params, *, tile_m=512):
    """Predict next state from (state, action) with a fused Pallas kernel.

    state:  [B, state_size]  float32
    action: [B, action_size] float32
    params: dict with
        w1_s [S, Hp] bf16, w1_a [A, Hp] bf16, b1 [1, Hp] f32,
        w2 [Hp, state_size] bf16, b2 [1, state_size] f32
      (Hp = hidden padded to a multiple of 128; output dim is NOT padded).
    """
    w1_s, w1_a = params["w1_s"], params["w1_a"]
    b1, w2, b2 = params["b1"], params["w2"], params["b2"]

    B, S = state.shape
    A = action.shape[1]
    Hp = w1_s.shape[1]
    So = w2.shape[1]            # true state_size (unpadded output width)

    # Batch tile: multiple of 8 sublanes; capped at ceil(B/2) so the grid has
    # >= 2 steps whenever B > 8 (lets v7x megacore shard the batch axis).
    TM = max(8, min(_round_up(tile_m, 8), _round_up(pl.cdiv(B, 2), 8)))

    def vmem_estimate(tm):
        weight_bytes = (w1_s.size * w1_s.dtype.itemsize
                        + w1_a.size * w1_a.dtype.itemsize
                        + w2.size * w2.dtype.itemsize
                        + 4 * (b1.size + b2.size))
        act_bytes = 2 * tm * (S + A) * 4 + 2 * tm * So * 4   # double-buffered tiles
        hidden_bytes = tm * Hp * 4                           # f32 hidden intermediate
        return 2 * weight_bytes + act_bytes + hidden_bytes

    VMEM_BUDGET = 48 * 1024 * 1024   # conservative: fits v7x's 64 MiB physical VMEM
    while TM > 8 and vmem_estimate(TM) > VMEM_BUDGET:
        TM = max(8, _round_up(TM // 2, 8))

    # Ragged last block: OOB input rows are garbage but row-independent, and
    # the corresponding output rows are masked on write — no wrapper pad pass.
    grid = (pl.cdiv(B, TM),)

    # Weights / biases stay resident in VMEM across all batch tiles.
    resident = lambda arr: pl.BlockSpec(arr.shape, lambda i: (0,) * arr.ndim)

    flops = 2 * B * (S * Hp + A * Hp + Hp * So)
    bytes_accessed = (4 * B * (S + A + So)
                      + w1_s.size * w1_s.dtype.itemsize
                      + w1_a.size * w1_a.dtype.itemsize
                      + w2.size * w2.dtype.itemsize
                      + 4 * (b1.size + b2.size))

    return pl.pallas_call(
        _forward_dynamic_kernel,
        out_shape=jax.ShapeDtypeStruct((B, So), state.dtype),
        grid=grid,
        in_specs=[
            pl.BlockSpec((TM, S), lambda i: (i, 0)),   # state batch tile
            pl.BlockSpec((TM, A), lambda i: (i, 0)),   # action batch tile
            resident(w1_s),
            resident(w1_a),
            resident(b1),
            resident(w2),
            resident(b2),
        ],
        # Block last dim == full array dim (state_size), so no 128-padding of
        # the output: 4x less HBM writeback at small state_size, no slice copy.
        out_specs=pl.BlockSpec((TM, So), lambda i: (i, 0)),
        compiler_params=pltpu.CompilerParams(
            dimension_semantics=("parallel",),
            vmem_limit_bytes=int(min(max(2 * vmem_estimate(TM),
                                         16 * 1024 * 1024), VMEM_BUDGET))),
        cost_estimate=pl.CostEstimate(
            flops=flops, transcendentals=0, bytes_accessed=bytes_accessed),
    )(state, action, w1_s, w1_a, b1, w2, b2)


def init_params(state_size, action_size, hidden, *, weight_dtype=jnp.bfloat16):
    """Deterministic synthetic init: split W1, hidden padded to 128, bf16 weights."""
    hp = _round_up(hidden, 128)

    key = jax.random.PRNGKey(42)
    k1, k2, k3, k4 = jax.random.split(key, 4)
    in_dim = state_size + action_size
    scale1 = 1.0 / jnp.sqrt(jnp.asarray(in_dim, jnp.float32))
    scale2 = 1.0 / jnp.sqrt(jnp.asarray(hidden, jnp.float32))

    w1 = jax.random.normal(k1, (in_dim, hidden), jnp.float32) * scale1
    b1 = jax.random.normal(k2, (1, hidden), jnp.float32) * 0.01
    w2 = jax.random.normal(k3, (hidden, state_size), jnp.float32) * scale2
    b2 = jax.random.normal(k4, (1, state_size), jnp.float32) * 0.01

    # Split W1 by input rows (state / action); zero-pad only the hidden dim.
    # Padding is exact: padded hidden units are relu(0)=0 and hit zero rows of
    # W2.  Weights stored bf16 (single-pass MXU, half the HBM/VMEM bytes);
    # biases kept f32 (added to the f32 accumulator, negligible bytes).
    return {
        "w1_s": jnp.pad(w1[:state_size], ((0, 0), (0, hp - hidden))).astype(weight_dtype),
        "w1_a": jnp.pad(w1[state_size:], ((0, 0), (0, hp - hidden))).astype(weight_dtype),
        "b1":   jnp.pad(b1, ((0, 0), (0, hp - hidden))),
        "w2":   jnp.pad(w2, ((0, hp - hidden), (0, 0))).astype(weight_dtype),
        "b2":   b2,
        "state_size": state_size,
        "hidden": hidden,
    }


def _reference(state, action, params):
    """Pure-JAX reference mirroring the kernel's bf16-operand / f32-accum math."""
    f32, bf = jnp.float32, jnp.bfloat16
    w1s = params["w1_s"].astype(f32)
    w1a = params["w1_a"].astype(f32)
    w2 = params["w2"].astype(f32)
    h = (state.astype(bf).astype(f32) @ w1s
         + action.astype(bf).astype(f32) @ w1a
         + params["b1"])
    h = jnp.maximum(h, 0.0)
    return h.astype(bf).astype(f32) @ w2 + params["b2"]


if __name__ == "__main__":
    state_size = 32
    action_size = 16
    hidden = 64

    params = init_params(state_size, action_size, hidden)

    key = jax.random.PRNGKey(0)
    ks, ka, ks2, ka2 = jax.random.split(key, 4)

    # Small config (single grid step, TM == B == 8).
    batch = 8
    state = jax.random.normal(ks, (batch, state_size), jnp.float32)
    action = jax.random.normal(ka, (batch, action_size), jnp.float32)
    out = jax.block_until_ready(forward_dynamic(state, action, params))
    ref = _reference(state, action, params)
    assert out.shape == (batch, state_size), out.shape
    assert jnp.allclose(out, ref, atol=2e-2, rtol=2e-2), "mismatch vs reference"

    # Larger batch exercising multiple grid steps + a RAGGED last block
    # (B=40, TM=16 -> grid=3, last block has 8 valid rows) with no wrapper pad.
    batch2 = 40
    state2 = jax.random.normal(ks2, (batch2, state_size), jnp.float32)
    action2 = jax.random.normal(ka2, (batch2, action_size), jnp.float32)
    out2 = jax.block_until_ready(forward_dynamic(state2, action2, params, tile_m=16))
    ref2 = _reference(state2, action2, params)
    assert out2.shape == (batch2, state_size), out2.shape
    assert jnp.allclose(out2, ref2, atol=2e-2, rtol=2e-2), "mismatch vs reference (ragged)"

    print("KERNEL_OK")
</pallas_src>

<mosaic_0001>
module attributes {stable_mosaic.version = 11 : i64} {
  func.func @_forward_dynamic_kernel(%arg0: i32, %arg1: memref<8x32xf32, #tpu.memory_space<vmem>>, %arg2: memref<8x16xf32, #tpu.memory_space<vmem>>, %arg3: memref<32x128xbf16, #tpu.memory_space<vmem>>, %arg4: memref<16x128xbf16, #tpu.memory_space<vmem>>, %arg5: memref<1x128xf32, #tpu.memory_space<vmem>>, %arg6: memref<128x32xbf16, #tpu.memory_space<vmem>>, %arg7: memref<1x32xf32, #tpu.memory_space<vmem>>, %arg8: memref<8x32xf32, #tpu.memory_space<vmem>>) attributes {dimension_semantics = [#tpu.dimension_semantics<parallel>], iteration_bounds = array<i64: 1>, scalar_prefetch = 0 : i64, scratch_operands = 0 : i64, tpu.core_type = #tpu.core_type<tc>, window_params = [{transform_indices = @transform_0, window_bounds = array<i64: 8, 32>}, {transform_indices = @transform_1, window_bounds = array<i64: 8, 16>}, {pipeline_mode = #tpu.pipeline_mode<synchronous>, transform_indices = @transform_2, window_bounds = array<i64: 32, 128>}, {pipeline_mode = #tpu.pipeline_mode<synchronous>, transform_indices = @transform_3, window_bounds = array<i64: 16, 128>}, {pipeline_mode = #tpu.pipeline_mode<synchronous>, transform_indices = @transform_4, window_bounds = array<i64: 1, 128>}, {pipeline_mode = #tpu.pipeline_mode<synchronous>, transform_indices = @transform_5, window_bounds = array<i64: 128, 32>}, {pipeline_mode = #tpu.pipeline_mode<synchronous>, transform_indices = @transform_6, window_bounds = array<i64: 1, 32>}, {transform_indices = @transform_7, window_bounds = array<i64: 8, 32>}]} {
    %c0 = arith.constant 0 : index
    %c0_0 = arith.constant 0 : index
    %0 = vector.load %arg1[%c0, %c0_0] : memref<8x32xf32, #tpu.memory_space<vmem>>, vector<8x32xf32>
    %1 = arith.truncf %0 : vector<8x32xf32> to vector<8x32xbf16>
    %c0_1 = arith.constant 0 : index
    %c0_2 = arith.constant 0 : index
    %2 = vector.load %arg2[%c0_1, %c0_2] : memref<8x16xf32, #tpu.memory_space<vmem>>, vector<8x16xf32>
    %3 = arith.truncf %2 : vector<8x16xf32> to vector<8x16xbf16>
    %c0_3 = arith.constant 0 : index
    %c0_4 = arith.constant 0 : index
    %4 = vector.load %arg3[%c0_3, %c0_4] : memref<32x128xbf16, #tpu.memory_space<vmem>>, vector<32x128xbf16>
    %cst = arith.constant dense<0.000000e+00> : vector<8x128xf32>
    %5 = tpu.matmul %1, %4, %cst {dimension_numbers = #tpu.dot_dimension_numbers<[1], [0], [0], [1], [0, 0, 1, 1], [], []>} : vector<8x32xbf16>, vector<32x128xbf16>, vector<8x128xf32> -> vector<8x128xf32>
    %c0_5 = arith.constant 0 : index
    %c0_6 = arith.constant 0 : index
    %6 = vector.load %arg4[%c0_5, %c0_6] : memref<16x128xbf16, #tpu.memory_space<vmem>>, vector<16x128xbf16>
    %cst_7 = arith.constant dense<0.000000e+00> : vector<8x128xf32>
    %7 = tpu.matmul %3, %6, %cst_7 {dimension_numbers = #tpu.dot_dimension_numbers<[1], [0], [0], [1], [0, 0, 1, 1], [], []>} : vector<8x16xbf16>, vector<16x128xbf16>, vector<8x128xf32> -> vector<8x128xf32>
    %8 = arith.addf %5, %7 : vector<8x128xf32>
    %c0_8 = arith.constant 0 : index
    %c0_9 = arith.constant 0 : index
    %9 = vector.load %arg5[%c0_8, %c0_9] : memref<1x128xf32, #tpu.memory_space<vmem>>, vector<1x128xf32>
    %10 = vector.broadcast %9 : vector<1x128xf32> to vector<8x128xf32>
    %11 = arith.addf %8, %10 : vector<8x128xf32>
    %cst_10 = arith.constant 0.000000e+00 : f32
    %12 = vector.broadcast %cst_10 : f32 to vector<8x128xf32>
    %13 = arith.maximumf %11, %12 : vector<8x128xf32>
    %14 = arith.truncf %13 : vector<8x128xf32> to vector<8x128xbf16>
    %c0_11 = arith.constant 0 : index
    %c0_12 = arith.constant 0 : index
    %15 = vector.load %arg6[%c0_11, %c0_12] : memref<128x32xbf16, #tpu.memory_space<vmem>>, vector<128x32xbf16>
    %cst_13 = arith.constant dense<0.000000e+00> : vector<8x32xf32>
    %16 = tpu.matmul %14, %15, %cst_13 {dimension_numbers = #tpu.dot_dimension_numbers<[1], [0], [0], [1], [0, 0, 1, 1], [], []>} : vector<8x128xbf16>, vector<128x32xbf16>, vector<8x32xf32> -> vector<8x32xf32>
    %c0_14 = arith.constant 0 : index
    %c0_15 = arith.constant 0 : index
    %17 = vector.load %arg7[%c0_14, %c0_15] : memref<1x32xf32, #tpu.memory_space<vmem>>, vector<1x32xf32>
    %18 = vector.broadcast %17 : vector<1x32xf32> to vector<8x32xf32>
    %19 = arith.addf %16, %18 : vector<8x32xf32>
    %c0_16 = arith.constant 0 : index
    %c0_17 = arith.constant 0 : index
    %20 = vector.load %arg8[%c0_16, %c0_17] : memref<8x32xf32, #tpu.memory_space<vmem>>, vector<8x32xf32>
    tpu.vector_store %arg8[%c0_16, %c0_17], %19 {strides = array<i32>} : memref<8x32xf32, #tpu.memory_space<vmem>>, vector<8x32xf32>,
    return
  }
  func.func @transform_0(%arg0: i32) -> (i32, i32) {
    %c0_i32 = arith.constant 0 : i32
    %c0_i32_0 = arith.constant 0 : i32
    return %arg0, %c0_i32 : i32, i32
  }
  func.func @transform_1(%arg0: i32) -> (i32, i32) {
    %c0_i32 = arith.constant 0 : i32
    %c0_i32_0 = arith.constant 0 : i32
    return %arg0, %c0_i32 : i32, i32
  }
  func.func @transform_2(%arg0: i32) -> (i32, i32) {
    %c0_i32 = arith.constant 0 : i32
    %c0_i32_0 = arith.constant 0 : i32
    %c0_i32_1 = arith.constant 0 : i32
    return %c0_i32, %c0_i32_0 : i32, i32
  }
  func.func @transform_3(%arg0: i32) -> (i32, i32) {
    %c0_i32 = arith.constant 0 : i32
    %c0_i32_0 = arith.constant 0 : i32
    %c0_i32_1 = arith.constant 0 : i32
    return %c0_i32, %c0_i32_0 : i32, i32
  }
  func.func @transform_4(%arg0: i32) -> (i32, i32) {
    %c0_i32 = arith.constant 0 : i32
    %c0_i32_0 = arith.constant 0 : i32
    %c0_i32_1 = arith.constant 0 : i32
    return %c0_i32, %c0_i32_0 : i32, i32
  }
  func.func @transform_5(%arg0: i32) -> (i32, i32) {
    %c0_i32 = arith.constant 0 : i32
    %c0_i32_0 = arith.constant 0 : i32
    %c0_i32_1 = arith.constant 0 : i32
    return %c0_i32, %c0_i32_0 : i32, i32
  }
  func.func @transform_6(%arg0: i32) -> (i32, i32) {
    %c0_i32 = arith.constant 0 : i32
    %c0_i32_0 = arith.constant 0 : i32
    %c0_i32_1 = arith.constant 0 : i32
    return %c0_i32, %c0_i32_0 : i32, i32
  }
  func.func @transform_7(%arg0: i32) -> (i32, i32) {
    %c0_i32 = arith.constant 0 : i32
    %c0_i32_0 = arith.constant 0 : i32
    return %arg0, %c0_i32 : i32, i32
  }
}

</mosaic_0001>

<bundles_post_ra>
// kernel: tpu_custom_call.1
= control target key start
LH: loop header
LB: loop body
LE: loop exit
PB: predicated region body
PF: predicated region fallthrough
CT: control target
= control target key end

     0   :  { %vm44_vm0 = vcmask 130048   ;;  %s372_s0 = inlined_call_operand.vmem [shape: f32[8,32], index: 0, kind: input, shape index: {}]   ;;  %s373_s1 = inlined_call_operand.vmem [shape: f32[8,16], index: 1, kind: input, shape index: {}]   ;;  %s374_s2 = inlined_call_operand.vmem [shape: bf16[32,128], index: 2, kind: input, shape index: {}]   ;;  %s375_s3 = inlined_call_operand.vmem [shape: bf16[16,128], index: 3, kind: input, shape index: {}]   ;;  %s376_s4 = inlined_call_operand.vmem [shape: f32[1,128], index: 4, kind: input, shape index: {}]   ;;  %s377_s5 = inlined_call_operand.vmem [shape: bf16[128,32], index: 5, kind: input, shape index: {}]   ;;  %s378_s6 = inlined_call_operand.vmem [shape: f32[1,32], index: 6, kind: input, shape index: {}]   ;;  %s379_s7 = inlined_call_operand.hbm [shape: f32[8,32], index: 7, kind: output, shape index: {}]  }
   0x1   :  { %v243_v0 = vld [vmem:[%s375_s3] sm:$0xff]  ;;  %v242_v1 = vld [vmem:[%s374_s2 + $0x8] sm:$0xff]  ;;  %v251_v4 = vld [vmem:[%s377_s5 + $0x38] sm:$0xff] }
   0x2   :  { %v30_v2 = vld [vmem:[%s373_s1] sm:$0xff]  ;;  %55 = vmatpush.bf16.msra.mxu0 %v243_v0  ;;  %83 = vmatpush.bf16.msra.mxu1 %v242_v1  ;;  %v250_v7 = vld [vmem:[%s377_s5 + $0x30] sm:$0xff] }
   0x3   :  { %v31_v3 = vpack.c.bf16 %v30_v2, %v30_v2  ;;  %v241_v5 = vld [vmem:[%s374_s2] sm:$0xff]  ;;  %165 = vmatpush.bf16.msra.mxu2 %v251_v4 }
   0x4   :  { %v28_v6 = vld [vmem:[%s372_s0] sm:$0xff] }
   0x5   :  { %12 = vsyncpa [#allocation3], 0  ;;  %199 = vmatmul.msk.bf16.vlgmr.msra.gmra.mxu0 %vm44_vm0, %v31_v3  ;;  %v29_v8 = vpack.c.bf16 %v28_v6, %v28_v6  ;;  %vm73_vm1 = vcmask 261120   ;;  %v249_v9 = vld [vmem:[%s377_s5 + $0x28] sm:$0xff]  ;;  %v248_v10 = vld [vmem:[%s377_s5 + $0x20] sm:$0xff]  ;;  %s281_s27 = smov [#allocation2]  }
   0x6   :  { %84 = vmatpush.bf16.msra.mxu1 %v241_v5  ;;  %v247_v11 = vld [vmem:[%s377_s5 + $0x18] sm:$0xff]  ;;  %v246_v12 = vld [vmem:[%s377_s5 + $0x10] sm:$0xff]  ;;  %v245_v13 = vld [vmem:[%s377_s5 + $0x8] sm:$0xff]  ;;  %s186_s30 = sshll.u32 %s379_s7, 4  ;;  %s187_s30 = int_to_ptr.hbm [resolvable:$true] %s186_s30 }
   0x7   :  { %166 = vmatpush.bf16.msra.mxu2 %v250_v7  ;;  %v244_v14 = vld [vmem:[%s377_s5] sm:$0xff]  ;;  %s184_s5 = sshll.u32 %s281_s27, 4  ;;  %s185_s5 = int_to_ptr.vmem [resolvable:$true] %s184_s5 }
   0x8   :  { %v253_v16 = vld [vmem:[%s376_s4] ss:$0 sm:$0xff] }
   0x9   :  { %208 = vmatmul.msk.bf16.vlgmr.msra.gmra.mxu1 %vm73_vm1, %v29_v8  ;;  %v254_v24 = vld [vmem:[%s378_s6] ss:$0 sm:$0xff] }
   0xb   :  { %167 = vmatpush.bf16.msra.mxu2 %v249_v9 }
   0xf   :  { %168 = vmatpush.bf16.msra.mxu2 %v248_v10 }
  0x13   :  { %169 = vmatpush.bf16.msra.mxu2 %v247_v11 }
  0x17   :  { %170 = vmatpush.bf16.msra.mxu2 %v246_v12 }
  0x1b   :  { %171 = vmatpush.bf16.msra.mxu2 %v245_v13 }
  0x1f   :  { %172 = vmatpush.bf16.msra.mxu2 %v244_v14 }
  0x82   :  { %v57_v15 = vpop.f32.mrf.mxu0 }
  0x86   :  { %v86_v17 = vpop.f32.mrf.mxu1 }
  0x87   :  { %v87_v18 = vadd.f32 %v86_v17, %v57_v15 }
  0x89   :  { %v94_v19 = vadd.f32 %v253_v16, %v87_v18 }
  0x8a   :  { %v59_v20 = vpop.f32.mrf.mxu0 }
  0x8b   :  { %v95_v21 = vmax.f32 %v94_v19, 0.0 }
  0x8d   :  { %v96_v22 = vpack.c.bf16 %v95_v21, %v95_v21 }
  0x8e   :  { %v88_v23 = vpop.f32.mrf.mxu1 }
  0x8f   :  { %173 = vmatmul.bf16.vlgmr.msra.gmra.mxu2 %v96_v22 }
 0x112   :  { %v174_v25 = vpop.f32.mrf.mxu2 }
 0x113   :  { %v175_v26 = vadd.f32 %v254_v24, %v174_v25 }
 0x115   :  { %178 = vst.msk [vmem:[#allocation2] sm:$0xff] %vm73_vm1, %v175_v26 }
 0x116   :  { %189 = dma.vmem_to_hbm [thread:$0]  %s185_s5, 128, %s187_s30, [#allocation3]  }
 0x11a   :  { %v176_v27 = vpop.f32.mrf.mxu2 }
 0x11b   :  { %279 = dma.done.wait [#allocation3], 128  }
 0x11c   :  { %280 = vsyncadd [#allocation3], 4294967168 }
 0x11d   :  { %194 = vsyncpa [#allocation3], 1 }

</bundles_post_ra>
